<compile_context>
chip_gen: v5e
topology: v5e:2x2
jax: 0.10.0
libtpu: 0.0.40
codegen_flags: <defaults>
</compile_context>

<pallas_src>
import functools

import numpy as np

import jax
import jax.numpy as jnp
from jax.experimental import pallas as pl
from jax.experimental.pallas import tpu as pltpu


def _infonce_kernel(dist_ref, y1_ref, y2_ref, out_ref, *, inv_temp, row_tile):
    """Per-row InfoNCE loss for one row block (fully independent per row)."""
    i = pl.program_id(0)

    z = dist_ref[...].astype(jnp.float32) * inv_temp          # (row_tile, B)

    # Diagonal (self-similarity) mask: one full-width iota + one full-width
    # compare; the global row ids live in a cheap (row_tile, 1) column.
    col_ids = jax.lax.broadcasted_iota(jnp.int32, z.shape, 1)
    row_ids = i * row_tile + jax.lax.broadcasted_iota(
        jnp.int32, (row_tile, 1), 0)
    diag = col_ids == row_ids                                  # (row_tile, B)

    z_nd = jnp.where(diag, -jnp.inf, z)                        # exclude self-sim

    m = jnp.max(z_nd, axis=-1, keepdims=True)                  # (row_tile, 1)
    sumexp = jnp.sum(jnp.exp(z_nd - m), axis=-1, keepdims=True)
    lse = m + jnp.log(sumexp)                                  # logsumexp_{j != i}

    # Exactly one off-diagonal positive per row (module contract); the
    # diagonal exclusion comes for free from z_nd's -inf.
    pos = y1_ref[...] == y2_ref[...]                           # (row_tile, B)
    z_pos = jnp.max(jnp.where(pos, z_nd, -jnp.inf), axis=-1, keepdims=True)

    out_ref[...] = lse - z_pos                                 # per-row loss


# Target bytes of the dist block per grid step.  Peak scoped VMEM is roughly
# 2x this (double buffering) plus a few block-sized elementwise temporaries,
# so ~8 MiB keeps the total comfortably under the 48 MiB limit below (and
# under v7x's 64 MiB physical VMEM) while amortizing per-step overhead.
_BLOCK_TARGET_BYTES = 8 * 1024 * 1024
_VMEM_LIMIT_BYTES = 48 * 1024 * 1024


def _sublane_align(dtype):
    """Minimum row alignment for the dtype's sublane packing."""
    return {4: 8, 2: 16, 1: 32}.get(jnp.dtype(dtype).itemsize, 8)


def _choose_row_tile(B, dtype):
    """Largest aligned row tile keeping the dist block near the byte target."""
    align = _sublane_align(dtype)
    if B <= align:
        return B
    itemsize = jnp.dtype(dtype).itemsize
    rows = _BLOCK_TARGET_BYTES // (B * itemsize)
    rows = max(align, (rows // align) * align)
    return B if rows >= B else rows


def infonce(dist, y1, y2, *, temperature=0.07, row_tile=None):
    """InfoNCE loss. dist: (B, B) similarities; y1, y2: length-B integer labels.

    Semantics match the PyTorch module: positives are (y1[i] == y2[j]) with the
    diagonal removed; every row must have exactly one off-diagonal positive.
    """
    dist = jnp.asarray(dist)
    B, B2 = dist.shape
    assert B == B2 and B >= 2, "dist must be a square (B, B) matrix with B >= 2"
    y1 = jnp.asarray(y1).reshape(-1).astype(jnp.int32)
    y2 = jnp.asarray(y2).reshape(-1).astype(jnp.int32)
    assert y1.shape == (B,) and y2.shape == (B,), "labels must have length B"

    align = _sublane_align(dist.dtype)
    if row_tile is None:
        row_tile = _choose_row_tile(B, dist.dtype)
    row_tile = min(int(row_tile), B)
    if row_tile < B:
        row_tile = max(align, (row_tile // align) * align)

    grid = (pl.cdiv(B, row_tile),)
    kernel = functools.partial(
        _infonce_kernel,
        inv_temp=1.0 / temperature,
        row_tile=row_tile,
    )

    itemsize = jnp.dtype(dist.dtype).itemsize
    cost = pl.CostEstimate(
        flops=12 * B * B,
        transcendentals=B * B,
        bytes_accessed=B * B * itemsize + 2 * B * 4 + B * 4,
    )

    per_row = pl.pallas_call(
        kernel,
        out_shape=jax.ShapeDtypeStruct((B, 1), jnp.float32),
        grid_spec=pltpu.PrefetchScalarGridSpec(
            num_scalar_prefetch=0,
            grid=grid,
            in_specs=[
                pl.BlockSpec((row_tile, B), lambda i: (i, 0)),   # dist rows, lane-dense
                pl.BlockSpec((row_tile, 1), lambda i: (i, 0)),   # y1 label column
                pl.BlockSpec((1, B), lambda i: (0, 0)),          # y2 label row (resident)
            ],
            out_specs=pl.BlockSpec((row_tile, 1), lambda i: (i, 0)),
        ),
        compiler_params=pltpu.CompilerParams(
            dimension_semantics=("parallel",),       # row blocks are independent
            vmem_limit_bytes=_VMEM_LIMIT_BYTES,      # safe on v5e/v6e/v7x
        ),
        cost_estimate=cost,
    )(dist, y1.reshape(B, 1), y2.reshape(1, B))

    # Tiny O(B) reduction done by XLA outside the kernel (keeps the grid axis
    # parallel so both v7x TensorCores can be used).
    return jnp.sum(per_row) * (1.0 / B)


def _reference_numpy(dist, y1, y2, temperature=0.07):
    """Literal float64 port of the PyTorch InfoNCE forward."""
    dist = np.asarray(dist, dtype=np.float64)
    y1 = np.asarray(y1).reshape(-1)
    y2 = np.asarray(y2).reshape(-1)
    B = dist.shape[0]
    y = y1[:, None] == y2[None, :]
    mask = np.eye(B, dtype=bool)
    logits = dist[~mask].reshape(B, B - 1) / temperature
    y_r = y[~mask].reshape(B, B - 1)
    targets = np.nonzero(y_r)[1]
    assert targets.shape == (B,), "need exactly one off-diagonal positive per row"
    m = logits.max(axis=1, keepdims=True)
    lse = np.log(np.exp(logits - m).sum(axis=1)) + m[:, 0]
    ce = lse - logits[np.arange(B), targets]
    return np.float32(ce.mean())


if __name__ == "__main__":
    key = jax.random.PRNGKey(0)
    k_dist, k_perm = jax.random.split(key)

    # Small InfoNCE setup: batch of 16 = 8 instances x 2 views, so every row
    # has exactly one off-diagonal positive (required by the original module).
    B = 16
    labels = jnp.repeat(jnp.arange(B // 2, dtype=jnp.int32), 2)
    labels = jax.random.permutation(k_perm, labels)
    dist = jax.random.normal(k_dist, (B, B), dtype=jnp.float32)
    y1 = labels
    y2 = labels

    out = jax.block_until_ready(infonce(dist, y1, y2))

    ref = _reference_numpy(np.asarray(dist), np.asarray(y1), np.asarray(y2))
    assert np.allclose(np.asarray(out), ref, rtol=1e-4, atol=1e-4), (out, ref)

    print("KERNEL_OK")
</pallas_src>

<mosaic_0001>
module attributes {stable_mosaic.version = 11 : i64} {
  func.func @_infonce_kernel(%arg0: i32, %arg1: memref<16x16xf32, #tpu.memory_space<vmem>>, %arg2: memref<16x1xi32, #tpu.memory_space<vmem>>, %arg3: memref<1x16xi32, #tpu.memory_space<vmem>>, %arg4: memref<16x1xf32, #tpu.memory_space<vmem>>) attributes {dimension_semantics = [#tpu.dimension_semantics<parallel>], iteration_bounds = array<i64: 1>, scalar_prefetch = 0 : i64, scratch_operands = 0 : i64, tpu.core_type = #tpu.core_type<tc>, window_params = [{transform_indices = @transform_0, window_bounds = array<i64: 16, 16>}, {transform_indices = @transform_1, window_bounds = array<i64: 16, 1>}, {pipeline_mode = #tpu.pipeline_mode<synchronous>, transform_indices = @transform_2, window_bounds = array<i64: 1, 16>}, {transform_indices = @transform_3, window_bounds = array<i64: 16, 1>}]} {
    %c0 = arith.constant 0 : index
    %c0_0 = arith.constant 0 : index
    %0 = vector.load %arg1[%c0, %c0_0] : memref<16x16xf32, #tpu.memory_space<vmem>>, vector<16x16xf32>
    %cst = arith.constant 14.2857141 : f32
    %1 = vector.broadcast %cst : f32 to vector<16x16xf32>
    %2 = arith.mulf %0, %1 : vector<16x16xf32>
    %3 = tpu.iota {dimensions = array<i32: 1>} : vector<16x16xi32>
    %c16_i32 = arith.constant 16 : i32
    %4 = arith.muli %arg0, %c16_i32 : i32
    %5 = tpu.iota {dimensions = array<i32: 0>} : vector<16x1xi32>
    %6 = vector.broadcast %4 : i32 to vector<16x1xi32>
    %7 = arith.addi %6, %5 : vector<16x1xi32>
    %8 = vector.broadcast %7 : vector<16x1xi32> to vector<16x16xi32>
    %9 = arith.cmpi eq, %3, %8 : vector<16x16xi32>
    %cst_1 = arith.constant 0xFF800000 : f32
    %10 = vector.broadcast %cst_1 : f32 to vector<16x16xf32>
    %11 = arith.select %9, %10, %2 : vector<16x16xi1>, vector<16x16xf32>
    %cst_2 = arith.constant dense<0xFF800000> : vector<16xf32>
    %12 = vector.multi_reduction <maximumf>, %11, %cst_2 [1] : vector<16x16xf32> to vector<16xf32>
    %13 = vector.shape_cast %12 : vector<16xf32> to vector<16x1xf32>
    %14 = vector.broadcast %13 : vector<16x1xf32> to vector<16x16xf32>
    %15 = arith.subf %11, %14 : vector<16x16xf32>
    %16 = math.exp %15 : vector<16x16xf32>
    %cst_3 = arith.constant dense<0.000000e+00> : vector<16xf32>
    %17 = vector.multi_reduction <add>, %16, %cst_3 [1] : vector<16x16xf32> to vector<16xf32>
    %18 = vector.shape_cast %17 : vector<16xf32> to vector<16x1xf32>
    %19 = math.log %18 : vector<16x1xf32>
    %20 = arith.addf %13, %19 : vector<16x1xf32>
    %c0_4 = arith.constant 0 : index
    %c0_5 = arith.constant 0 : index
    %21 = vector.load %arg2[%c0_4, %c0_5] : memref<16x1xi32, #tpu.memory_space<vmem>>, vector<16x1xi32>
    %c0_6 = arith.constant 0 : index
    %c0_7 = arith.constant 0 : index
    %22 = vector.load %arg3[%c0_6, %c0_7] : memref<1x16xi32, #tpu.memory_space<vmem>>, vector<1x16xi32>
    %23 = vector.broadcast %21 : vector<16x1xi32> to vector<16x16xi32>
    %24 = vector.broadcast %22 : vector<1x16xi32> to vector<16x16xi32>
    %25 = arith.cmpi eq, %23, %24 : vector<16x16xi32>
    %cst_8 = arith.constant 0xFF800000 : f32
    %26 = vector.broadcast %cst_8 : f32 to vector<16x16xf32>
    %27 = arith.select %25, %11, %26 : vector<16x16xi1>, vector<16x16xf32>
    %cst_9 = arith.constant dense<0xFF800000> : vector<16xf32>
    %28 = vector.multi_reduction <maximumf>, %27, %cst_9 [1] : vector<16x16xf32> to vector<16xf32>
    %29 = vector.shape_cast %28 : vector<16xf32> to vector<16x1xf32>
    %30 = arith.subf %20, %29 : vector<16x1xf32>
    %c0_10 = arith.constant 0 : index
    %c0_11 = arith.constant 0 : index
    %31 = vector.load %arg4[%c0_10, %c0_11] : memref<16x1xf32, #tpu.memory_space<vmem>>, vector<16x1xf32>
    tpu.vector_store %arg4[%c0_10, %c0_11], %30 {strides = array<i32>} : memref<16x1xf32, #tpu.memory_space<vmem>>, vector<16x1xf32>,
    return
  }
  func.func @transform_0(%arg0: i32) -> (i32, i32) {
    %c0_i32 = arith.constant 0 : i32
    %c0_i32_0 = arith.constant 0 : i32
    return %arg0, %c0_i32 : i32, i32
  }
  func.func @transform_1(%arg0: i32) -> (i32, i32) {
    %c0_i32 = arith.constant 0 : i32
    %c0_i32_0 = arith.constant 0 : i32
    return %arg0, %c0_i32 : i32, i32
  }
  func.func @transform_2(%arg0: i32) -> (i32, i32) {
    %c0_i32 = arith.constant 0 : i32
    %c0_i32_0 = arith.constant 0 : i32
    %c0_i32_1 = arith.constant 0 : i32
    return %c0_i32, %c0_i32_0 : i32, i32
  }
  func.func @transform_3(%arg0: i32) -> (i32, i32) {
    %c0_i32 = arith.constant 0 : i32
    %c0_i32_0 = arith.constant 0 : i32
    return %arg0, %c0_i32 : i32, i32
  }
}

</mosaic_0001>

<bundles_post_ra>
// kernel: tpu_custom_call.1
= control target key start
LH: loop header
LB: loop body
LE: loop exit
PB: predicated region body
PF: predicated region fallthrough
CT: control target
= control target key end

     0   :  { %v18_v0 = vlaneseq  ;;  %v97_v2 = vmov 0   ;;  %vm31_vm0 = vcmask 130048   ;;  %vm78_vm5 = vcmask 7168   ;;  %s145_s0 = inlined_call_operand.vmem [shape: f32[16,16], index: 0, kind: input, shape index: {}]   ;;  %s146_s1 = inlined_call_operand.vmem [shape: s32[16,1], index: 1, kind: input, shape index: {}]   ;;  %s147_s2 = inlined_call_operand.vmem [shape: s32[1,16], index: 2, kind: input, shape index: {}]   ;;  %s148_s3 = inlined_call_operand.vmem [shape: f32[16,1], index: 3, kind: output, shape index: {}]  }
   0x1   :  { %v14_v1 = vld [vmem:[%s145_s0] sm:$0xff]  ;;  %86 = vset.pattern.permute.xlu1 %v97_v2  ;;  %87 = vset.pattern.permute.xlu0 %v97_v2  ;;  %v15_v7 = vld [vmem:[%s145_s0 + $0x8] sm:$0xff] }
   0x2   :  { %v56_v3 = vld [vmem:[%s146_s1] sm:$0xff]  ;;  %v16_v4 = vmul.f32 14.285714, %v14_v1  ;;  %v19_v5 = vand.u32 127, %v18_v0  ;;  %v22_v6 = vshrl.u32 %v18_v0, 7  ;;  %v57_v12 = vld [vmem:[%s146_s1 + $0x8] sm:$0xff] }
   0x3   :  { %60 = vperm.xlu1 %86, %v56_v3   ;;  %v17_v10 = vmul.f32 14.285714, %v15_v7  ;;  %v88_v15 = vld [vmem:[%s147_s2] ss:$0 sm:$0xff] }
   0x4   :  { %vm27_vm1 = vcmp.eq.s32.totalorder %v19_v5, %v22_v6  ;;  %v23_v8 = vadd.s32 8, %v22_v6 }
   0x5   :  { %v29_v9 = vsel %vm27_vm1, -inf, %v16_v4 }
   0x6   :  { %v32_v11 = vsel %vm31_vm0, %v29_v9, -inf  ;;  %vm28_vm2 = vcmp.eq.s32.totalorder %v19_v5, %v23_v8 }
   0x7   :  { %33 = vmax.xlane.f32.xlu0 %v32_v11  ;;  %v30_v13 = vsel %vm28_vm2, -inf, %v17_v10 }
   0x8   :  { %v35_v14 = vsel %vm31_vm0, %v30_v13, -inf }
   0xb   :  { %63 = vperm.xlu1 %86, %v57_v12  }
   0xf   :  { %36 = vmax.xlane.f32.xlu0 %v35_v14 }
  0x75   :  { %v61_v16 = vpop.permute.xlu1 %60 }
  0x76   :  { %vm66_vm3 = vcmp.eq.s32.totalorder %v61_v16, %v88_v15 }
  0x77   :  { %v68_v17 = vsel %vm66_vm3, %v29_v9, -inf }
  0x78   :  { %v70_v18 = vsel %vm31_vm0, %v68_v17, -inf }
  0x79   :  { %71 = vmax.xlane.f32.xlu0 %v70_v18 }
  0x7a   :  { %v34_v19 = vpop.xlane.xlu0 %33 }
  0x7b   :  { %v38_v20 = vsub.f32 %v29_v9, %v34_v19 }
  0x7d   :  { %v64_v21 = vpop.permute.xlu1 %63  ;;  %v40_v22 = vmul.f32 1.442695, %v38_v20 }
  0x7e   :  { %vm67_vm4 = vcmp.eq.s32.totalorder %v64_v21, %v88_v15 }
  0x7f   :  { %v69_v23 = vsel %vm67_vm4, %v30_v13, -inf  ;;  %89 = vpow2.f32 %v40_v22 }
  0x80   :  { %v73_v24 = vsel %vm31_vm0, %v69_v23, -inf }
  0x81   :  { %74 = vmax.xlane.f32.xlu1 %v73_v24 }
  0x82   :  { %v37_v25 = vpop.xlane.xlu0 %36 }
  0x83   :  { %v39_v26 = vsub.f32 %v30_v13, %v37_v25 }
  0x85   :  { %v90_v27 = vpop.eup %89  ;;  %v42_v28 = vmul.f32 1.442695, %v39_v26 }
  0x86   :  { %v44_v29 = vsel %vm31_vm0, %v90_v27, 0.0 }
  0x87   :  { %91 = vpow2.f32 %v42_v28  ;;  %45 = vadd.xlane.f32.xlu2 %v44_v29 }
  0x8d   :  { %v92_v30 = vpop.eup %91 }
  0x8e   :  { %v47_v31 = vsel %vm31_vm0, %v92_v30, 0.0 }
  0x8f   :  { %48 = vadd.xlane.f32.xlu2 %v47_v31 }
  0xec   :  { %v72_v36 = vpop.xlane.xlu0 %71 }
  0xf4   :  { %v75_v42 = vpop.xlane.xlu1 %74 }
  0xfa   :  { %v46_v32 = vpop.xlane.xlu2 %45 }
  0xfb   :  { %93 = vlog2.f32 %v46_v32 }
 0x101   :  { %v94_v33 = vpop.eup %93 }
 0x102   :  { %v51_v34 = vmul.f32 0.6931472, %v94_v33  ;;  %v49_v35 = vpop.xlane.xlu2 %48 }
 0x103   :  { %95 = vlog2.f32 %v49_v35 }
 0x104   :  { %v54_v37 = vadd.f32 %v51_v34, %v34_v19 }
 0x106   :  { %v76_v38 = vsub.f32 %v54_v37, %v72_v36 }
 0x108   :  { %79 = vst.msk [vmem:[%s148_s3] sm:$0xff] %vm78_vm5, %v76_v38 }
 0x109   :  { %v96_v39 = vpop.eup %95 }
 0x10a   :  { %v53_v40 = vmul.f32 0.6931472, %v96_v39 }
 0x10c   :  { %v55_v41 = vadd.f32 %v53_v40, %v37_v25 }
 0x10e   :  { %v77_v43 = vsub.f32 %v55_v41, %v75_v42 }
 0x110   :  { %80 = vst.msk [vmem:[%s148_s3 + $0x8] sm:$0xff] %vm78_vm5, %v77_v43 }

</bundles_post_ra>
